<compile_context>
chip_gen: v7x
topology: tpu7x:2x2x1
jax: 0.10.0
libtpu: 0.0.40
codegen_flags: <defaults>
</compile_context>

<pallas_src>
import functools

import jax
import jax.numpy as jnp
import numpy as np
from jax.experimental import pallas as pl
from jax.experimental.pallas import tpu as pltpu

# Globals matching vgae_motif.py
Lambda_dim = 32
out_channels = 48
node_trns_layers = [out_channels, 64, Lambda_dim]   # MLP hidden dims
BN_EPS = 1e-5


def _round_up(x, m):
    return ((x + m - 1) // m) * m


# ----------------------------------------------------------------------------
# Kernel
# ----------------------------------------------------------------------------
def _node_mlp_kernel(x_ref, *refs, act_last: bool):
    """One row-tile of the MLP in feature-major layout: h = tanh(W_i @ h + b_i).

    refs layout: (W0, b0, W1, b1, ..., out_ref).
      x_ref : [d_in0, TILE_N]   (nodes on the 128-lane axis)
      W_i   : [d_out_i, d_in_i] (BatchNorm folded in; f32 or bf16)
      b_i   : [d_out_i, 1]      (f32)
      out   : [d_out_last, TILE_N]
    """
    out_ref = refs[-1]
    param_refs = refs[:-1]
    n_layers = len(param_refs) // 2

    h = x_ref[...]                                        # [d_in0, TILE_N] f32
    for li in range(n_layers):
        w = param_refs[2 * li][...]                       # [d_out, d_in]
        b = param_refs[2 * li + 1][...]                   # [d_out, 1]
        # Cast activations to the weight dtype so the bf16 MXU fast path is
        # used when weights are bf16; always accumulate in f32.
        h = jnp.dot(w, h.astype(w.dtype),
                    preferred_element_type=jnp.float32) + b
        if li != n_layers - 1 or act_last:
            h = jnp.tanh(h)
    out_ref[...] = h.astype(out_ref.dtype)                # lane-dense single store


# ----------------------------------------------------------------------------
# Host-side helpers
# ----------------------------------------------------------------------------
def fold_bn_into_linear_fm(gamma, beta, mean, var, w, b, eps=BN_EPS,
                           weight_dtype=jnp.float32):
    """Fold eval-mode BatchNorm1d into the following Linear (feature-major).

    BN(h)         = h * s + t  with s = gamma / sqrt(var+eps), t = beta - mean*s
    Linear(BN(h)) = (W * s[None,:]) @ h + (W @ t + b)

    w: [d_out, d_in] (PyTorch nn.Linear layout), b: [d_out].
    Returns W' [d_out, d_in] in `weight_dtype`, b' [d_out, 1] in f32.
    """
    s = gamma / jnp.sqrt(var + eps)                  # [d_in]
    t = beta - mean * s                              # [d_in]
    w_f = (w * s[None, :]).astype(weight_dtype)      # [d_out, d_in]
    b_f = (w @ t + b).reshape(-1, 1).astype(jnp.float32)   # [d_out, 1]
    return w_f, b_f


def node_mlp_forward(x, folded_weights_fm, folded_biases_fm, *,
                     act_last=True, tile_n=2048):
    """Row-tiled Pallas MLP (nodes on the lane axis inside the kernel).

    x                 : [N, d_in0] float32
    folded_weights_fm : list of [d_out_i, d_in_i] (BN folded; f32 or bf16)
    folded_biases_fm  : list of [d_out_i, 1] float32
    """
    n, d_in = x.shape
    d_out = folded_weights_fm[-1].shape[0]

    # Node-tile size: multiple of 128 (lane axis), clamped for small inputs.
    # Sweep tile_n (1024/2048/4096/8192) for large graphs.
    tile = max(128, min(_round_up(tile_n, 128), _round_up(n, 128)))
    n_pad = _round_up(n, tile)
    grid = (n_pad // tile,)

    if n_pad != n:
        x = jnp.pad(x, ((0, n_pad - n), (0, 0)))
    x_t = x.T                                        # [d_in, n_pad]: layout plumbing

    operands = [x_t]
    in_specs = [pl.BlockSpec((d_in, tile), lambda i: (0, i))]
    for w, b in zip(folded_weights_fm, folded_biases_fm):
        operands += [w, b]
        # Constant block index => params stay resident, no per-step re-fetch.
        in_specs += [pl.BlockSpec(w.shape, lambda i: (0, 0)),
                     pl.BlockSpec(b.shape, lambda i: (0, 0))]
    out_specs = pl.BlockSpec((d_out, tile), lambda i: (0, i))

    n_layers = len(folded_weights_fm)
    flops = int(sum(2 * n_pad * w.shape[0] * w.shape[1]
                    for w in folded_weights_fm))
    transcendentals = int(sum(
        n_pad * folded_weights_fm[li].shape[0]
        for li in range(n_layers) if (li != n_layers - 1 or act_last)))
    bytes_accessed = int(
        x_t.size * x_t.dtype.itemsize
        + sum(int(np.prod(a.shape)) * a.dtype.itemsize for a in operands[1:])
        + n_pad * d_out * 4)

    kernel = functools.partial(_node_mlp_kernel, act_last=act_last)
    out_t = pl.pallas_call(
        kernel,
        out_shape=jax.ShapeDtypeStruct((d_out, n_pad), jnp.float32),
        grid=grid,
        in_specs=in_specs,
        out_specs=out_specs,
        compiler_params=pltpu.CompilerParams(
            dimension_semantics=("parallel",)),       # v7x megacore split
        cost_estimate=pl.CostEstimate(
            flops=flops,
            transcendentals=transcendentals,
            bytes_accessed=bytes_accessed),
    )(*operands)

    return out_t.T[:n]                                # back to [N, d_out]


def init_params(key, in_dim, layers):
    """Deterministic params mimicking PyTorch nn.Linear / BatchNorm1d state."""
    dims = [in_dim] + list(layers)
    weights, biases = [], []
    gammas, betas, means, variances = [], [], [], []
    for li in range(len(layers)):
        d_i, d_o = dims[li], dims[li + 1]
        key, kw, kb, kg, kbe, km, kv = jax.random.split(key, 7)
        bound = 1.0 / np.sqrt(d_i)                    # nn.Linear default-ish init
        w = jax.random.uniform(kw, (d_o, d_i), jnp.float32, -bound, bound)
        b = jax.random.uniform(kb, (d_o,), jnp.float32, -bound, bound)
        # Non-trivial BatchNorm state so the host-side fold is exercised.
        gamma = jax.random.uniform(kg, (d_i,), jnp.float32, 0.5, 1.5)
        beta = jax.random.uniform(kbe, (d_i,), jnp.float32, -0.5, 0.5)
        mean = jax.random.uniform(km, (d_i,), jnp.float32, -0.5, 0.5)
        var = jax.random.uniform(kv, (d_i,), jnp.float32, 0.5, 1.5)
        weights.append(w)
        biases.append(b)
        gammas.append(gamma)
        betas.append(beta)
        means.append(mean)
        variances.append(var)
    return weights, biases, gammas, betas, means, variances


def reference_forward(x, weights, biases, gammas, betas, means, variances,
                      act_last=True, eps=BN_EPS):
    """Pure-JAX reference of node_mlp.forward (eval mode, tanh activation)."""
    h = x
    n_layers = len(weights)
    for i in range(n_layers):
        h = (h - means[i]) / jnp.sqrt(variances[i] + eps) * gammas[i] + betas[i]
        # dropout: identity in eval mode
        h = h @ weights[i].T + biases[i]
        if i != n_layers - 1 or act_last:
            h = jnp.tanh(h)
    return h


# ----------------------------------------------------------------------------
# Demo / self-test
# ----------------------------------------------------------------------------
if __name__ == "__main__":
    N = 1000                                   # nodes; deliberately not a tile multiple
    in_dim = Lambda_dim                        # 32
    layers = node_trns_layers                  # [48, 64, 32]

    key = jax.random.PRNGKey(0)
    key, kx = jax.random.split(key)
    x = jax.random.normal(kx, (N, in_dim), jnp.float32)

    (weights, biases, gammas, betas, means, variances) = init_params(
        key, in_dim, layers)

    ref = reference_forward(x, weights, biases, gammas, betas, means,
                            variances, act_last=True)
    ref = jax.block_until_ready(ref)

    # --- f32 path (default / conservative); small tile -> 2-step grid to
    #     exercise the pipeline and the constant-index weight blocks. ---
    fw32, fb32 = [], []
    for li in range(len(layers)):
        wf, bf = fold_bn_into_linear_fm(gammas[li], betas[li], means[li],
                                        variances[li], weights[li], biases[li],
                                        weight_dtype=jnp.float32)
        fw32.append(wf)
        fb32.append(bf)
    out32 = node_mlp_forward(x, fw32, fb32, act_last=True, tile_n=512)
    out32 = jax.block_until_ready(out32)
    assert out32.shape == (N, layers[-1])
    np.testing.assert_allclose(np.asarray(out32), np.asarray(ref),
                               rtol=1e-3, atol=2e-3)

    # --- bf16-weight path (bf16 MXU inputs, f32 accumulation); tolerance is
    #     deliberately relaxed for the reduced input precision. ---
    fwbf, fbbf = [], []
    for li in range(len(layers)):
        wf, bf = fold_bn_into_linear_fm(gammas[li], betas[li], means[li],
                                        variances[li], weights[li], biases[li],
                                        weight_dtype=jnp.bfloat16)
        fwbf.append(wf)
        fbbf.append(bf)
    outbf = node_mlp_forward(x, fwbf, fbbf, act_last=True)
    outbf = jax.block_until_ready(outbf)
    assert outbf.shape == (N, layers[-1])
    np.testing.assert_allclose(np.asarray(outbf), np.asarray(ref),
                               rtol=5e-2, atol=5e-2)

    print("KERNEL_OK")
</pallas_src>

<mosaic_0001>
module attributes {stable_mosaic.version = 11 : i64} {
  func.func @_node_mlp_kernel(%arg0: i32, %arg1: memref<32x512xf32, #tpu.memory_space<vmem>>, %arg2: memref<48x32xf32, #tpu.memory_space<vmem>>, %arg3: memref<48x1xf32, #tpu.memory_space<vmem>>, %arg4: memref<64x48xf32, #tpu.memory_space<vmem>>, %arg5: memref<64x1xf32, #tpu.memory_space<vmem>>, %arg6: memref<32x64xf32, #tpu.memory_space<vmem>>, %arg7: memref<32x1xf32, #tpu.memory_space<vmem>>, %arg8: memref<32x512xf32, #tpu.memory_space<vmem>>) attributes {dimension_semantics = [#tpu.dimension_semantics<parallel>], iteration_bounds = array<i64: 2>, scalar_prefetch = 0 : i64, scratch_operands = 0 : i64, tpu.core_type = #tpu.core_type<tc>, window_params = [{transform_indices = @transform_0, window_bounds = array<i64: 32, 512>}, {pipeline_mode = #tpu.pipeline_mode<synchronous>, transform_indices = @transform_1, window_bounds = array<i64: 48, 32>}, {pipeline_mode = #tpu.pipeline_mode<synchronous>, transform_indices = @transform_2, window_bounds = array<i64: 48, 1>}, {pipeline_mode = #tpu.pipeline_mode<synchronous>, transform_indices = @transform_3, window_bounds = array<i64: 64, 48>}, {pipeline_mode = #tpu.pipeline_mode<synchronous>, transform_indices = @transform_4, window_bounds = array<i64: 64, 1>}, {pipeline_mode = #tpu.pipeline_mode<synchronous>, transform_indices = @transform_5, window_bounds = array<i64: 32, 64>}, {pipeline_mode = #tpu.pipeline_mode<synchronous>, transform_indices = @transform_6, window_bounds = array<i64: 32, 1>}, {transform_indices = @transform_7, window_bounds = array<i64: 32, 512>}]} {
    %c0 = arith.constant 0 : index
    %c0_0 = arith.constant 0 : index
    %0 = vector.load %arg1[%c0, %c0_0] : memref<32x512xf32, #tpu.memory_space<vmem>>, vector<32x512xf32>
    %c0_1 = arith.constant 0 : index
    %c0_2 = arith.constant 0 : index
    %1 = vector.load %arg2[%c0_1, %c0_2] : memref<48x32xf32, #tpu.memory_space<vmem>>, vector<48x32xf32>
    %c0_3 = arith.constant 0 : index
    %c0_4 = arith.constant 0 : index
    %2 = vector.load %arg3[%c0_3, %c0_4] : memref<48x1xf32, #tpu.memory_space<vmem>>, vector<48x1xf32>
    %cst = arith.constant dense<0.000000e+00> : vector<48x512xf32>
    %3 = tpu.matmul %1, %0, %cst {dimension_numbers = #tpu.dot_dimension_numbers<[1], [0], [0], [1], [0, 0, 1, 1], [], []>} : vector<48x32xf32>, vector<32x512xf32>, vector<48x512xf32> -> vector<48x512xf32>
    %4 = vector.broadcast %2 : vector<48x1xf32> to vector<48x512xf32>
    %5 = arith.addf %3, %4 : vector<48x512xf32>
    %6 = math.tanh %5 : vector<48x512xf32>
    %c0_5 = arith.constant 0 : index
    %c0_6 = arith.constant 0 : index
    %7 = vector.load %arg4[%c0_5, %c0_6] : memref<64x48xf32, #tpu.memory_space<vmem>>, vector<64x48xf32>
    %c0_7 = arith.constant 0 : index
    %c0_8 = arith.constant 0 : index
    %8 = vector.load %arg5[%c0_7, %c0_8] : memref<64x1xf32, #tpu.memory_space<vmem>>, vector<64x1xf32>
    %cst_9 = arith.constant dense<0.000000e+00> : vector<64x512xf32>
    %9 = tpu.matmul %7, %6, %cst_9 {dimension_numbers = #tpu.dot_dimension_numbers<[1], [0], [0], [1], [0, 0, 1, 1], [], []>} : vector<64x48xf32>, vector<48x512xf32>, vector<64x512xf32> -> vector<64x512xf32>
    %10 = vector.broadcast %8 : vector<64x1xf32> to vector<64x512xf32>
    %11 = arith.addf %9, %10 : vector<64x512xf32>
    %12 = math.tanh %11 : vector<64x512xf32>
    %c0_10 = arith.constant 0 : index
    %c0_11 = arith.constant 0 : index
    %13 = vector.load %arg6[%c0_10, %c0_11] : memref<32x64xf32, #tpu.memory_space<vmem>>, vector<32x64xf32>
    %c0_12 = arith.constant 0 : index
    %c0_13 = arith.constant 0 : index
    %14 = vector.load %arg7[%c0_12, %c0_13] : memref<32x1xf32, #tpu.memory_space<vmem>>, vector<32x1xf32>
    %cst_14 = arith.constant dense<0.000000e+00> : vector<32x512xf32>
    %15 = tpu.matmul %13, %12, %cst_14 {dimension_numbers = #tpu.dot_dimension_numbers<[1], [0], [0], [1], [0, 0, 1, 1], [], []>} : vector<32x64xf32>, vector<64x512xf32>, vector<32x512xf32> -> vector<32x512xf32>
    %16 = vector.broadcast %14 : vector<32x1xf32> to vector<32x512xf32>
    %17 = arith.addf %15, %16 : vector<32x512xf32>
    %18 = math.tanh %17 : vector<32x512xf32>
    %c0_15 = arith.constant 0 : index
    %c0_16 = arith.constant 0 : index
    %19 = vector.load %arg8[%c0_15, %c0_16] : memref<32x512xf32, #tpu.memory_space<vmem>>, vector<32x512xf32>
    tpu.vector_store %arg8[%c0_15, %c0_16], %18 {strides = array<i32>} : memref<32x512xf32, #tpu.memory_space<vmem>>, vector<32x512xf32>,
    return
  }
  func.func @transform_0(%arg0: i32) -> (i32, i32) {
    %c0_i32 = arith.constant 0 : i32
    %c0_i32_0 = arith.constant 0 : i32
    return %c0_i32, %arg0 : i32, i32
  }
  func.func @transform_1(%arg0: i32) -> (i32, i32) {
    %c0_i32 = arith.constant 0 : i32
    %c0_i32_0 = arith.constant 0 : i32
    %c0_i32_1 = arith.constant 0 : i32
    return %c0_i32, %c0_i32_0 : i32, i32
  }
  func.func @transform_2(%arg0: i32) -> (i32, i32) {
    %c0_i32 = arith.constant 0 : i32
    %c0_i32_0 = arith.constant 0 : i32
    %c0_i32_1 = arith.constant 0 : i32
    return %c0_i32, %c0_i32_0 : i32, i32
  }
  func.func @transform_3(%arg0: i32) -> (i32, i32) {
    %c0_i32 = arith.constant 0 : i32
    %c0_i32_0 = arith.constant 0 : i32
    %c0_i32_1 = arith.constant 0 : i32
    return %c0_i32, %c0_i32_0 : i32, i32
  }
  func.func @transform_4(%arg0: i32) -> (i32, i32) {
    %c0_i32 = arith.constant 0 : i32
    %c0_i32_0 = arith.constant 0 : i32
    %c0_i32_1 = arith.constant 0 : i32
    return %c0_i32, %c0_i32_0 : i32, i32
  }
  func.func @transform_5(%arg0: i32) -> (i32, i32) {
    %c0_i32 = arith.constant 0 : i32
    %c0_i32_0 = arith.constant 0 : i32
    %c0_i32_1 = arith.constant 0 : i32
    return %c0_i32, %c0_i32_0 : i32, i32
  }
  func.func @transform_6(%arg0: i32) -> (i32, i32) {
    %c0_i32 = arith.constant 0 : i32
    %c0_i32_0 = arith.constant 0 : i32
    %c0_i32_1 = arith.constant 0 : i32
    return %c0_i32, %c0_i32_0 : i32, i32
  }
  func.func @transform_7(%arg0: i32) -> (i32, i32) {
    %c0_i32 = arith.constant 0 : i32
    %c0_i32_0 = arith.constant 0 : i32
    return %c0_i32, %arg0 : i32, i32
  }
}

</mosaic_0001>

<bundles_post_ra>
// kernel: tpu_custom_call.1
= control target key start
LH: loop header
LB: loop body
LE: loop exit
PB: predicated region body
PF: predicated region fallthrough
CT: control target
= control target key end

     0   :  { %12 = vsyncpa [#allocation4], 0  ;;  %s2061_s0 = inlined_call_operand.vmem [shape: f32[32,1024], index: 0, kind: input, shape index: {}]   ;;  %s2062_s1 = inlined_call_operand.vmem [shape: f32[48,32], index: 1, kind: input, shape index: {}]   ;;  %s2063_s2 = inlined_call_operand.vmem [shape: f32[48,1], index: 2, kind: input, shape index: {}]   ;;  %s2064_s3 = inlined_call_operand.vmem [shape: f32[64,48], index: 3, kind: input, shape index: {}]   ;;  %s2065_s4 = inlined_call_operand.vmem [shape: f32[64,1], index: 4, kind: input, shape index: {}]   ;;  %s2066_s5 = inlined_call_operand.vmem [shape: f32[32,64], index: 5, kind: input, shape index: {}]   ;;  %s2067_s6 = inlined_call_operand.vmem [shape: f32[32,1], index: 6, kind: input, shape index: {}]   ;;  %s2068_s7 = inlined_call_operand.hbm [shape: f32[32,1024], index: 7, kind: output, shape index: {}]  }
   0x1   :  { %14 = vsyncpa [#allocation4 + $0x1], 0  ;;  %s1728_s24 = smov 0   ;;  %s1730_s25 = smov 0  }
   0x2   :  { %s1732_s26 = smov 0   ;;  %s1734_s27 = smov 0  }
   0x3 LB: > { %s1303_s28 = sadd.s32 4294967295, %s1680_s27   ;;  %s1304_s29 = sadd.s32 4294967294, %s1680_s27   ;;  %s1680_s27 = sphi %s1734_s27, %s2074_s27   ;;  %s1676_s26 = sphi %s1732_s26, %s2073_s26   ;;  %s1672_s25 = sphi %s1730_s25, %s2072_s25   ;;  %s1668_s24 = sphi %s1728_s24, %s2071_s24  }
   0x4   : > { %s1751_s30 = sadd.s32 1, %s1680_s27   ;;  %s27_s8 = sadd.s32 1, %s1676_s26 }
   0x5   : > { %s24_s9 = ssub.s32 %s1680_s27, %s1751_s30  ;;  %p34_p0 = scmp.ne.s32.totalorder %s1676_s26, %s1672_s25 }
   0x6   : > { %p25_p1 = scmp.eq.s32.totalorder %s24_s9, 0  ;;  %p35_p2 = scmp.eq.s32.totalorder %s1680_s27, 0 }
   0x7   : > { %p190_p3 = scmp.eq.s32.totalorder %s1303_s28, 1  ;;  %p195_p4 = scmp.ne.s32.totalorder %s1672_s25, %s1668_s24 }
   0x8   : > { %s1764_s10 = scalar_select %p25_p1, %s1676_s26, %s27_s8  }
   0x9   : > { %p36_p5 = por %p35_p2, %p34_p0  ;;  %p1766_p6 = por %p190_p3, %p34_p0 }
   0xa   : > { %p196_p7 = scmp.eq.s32.totalorder %s1304_s29, 1  ;;  %p1306_p9 = scmp.ge.s32.totalorder %s1680_s27, 2 }
   0xc   : > { %p1770_p8 = por %p196_p7, %p195_p4  ;;  %230 = sbr.rel (%p1306_p9) target bundleno = 31 (0x1f), region = 40 }
  0x13   : > { %233 = sbr.rel (!%p36_p5) target bundleno = 31 (0x1f), region = 44  ;;  %s235_s13 = sand.u32 (%p36_p5), 1, %s1676_s26  }
  0x14   : > { %s1354_s14 = sshll.u32 (%p36_p5), %s1680_s27, 5  ;;  %s1307_s15 = sshll.u32 (%p36_p5), %s235_s13, 7 }
  0x15   : > { %s1782_s18 = scalar_lea.vmem (%p36_p5), %s2061_s0, %s1354_s14  ;;  %s237_s19 = scalar_lea.vmem (%p36_p5), [#allocation2], %s1307_s15 }
  0x16   : > { %v253_v0 = vld [vmem:[%s1782_s18] sm:$0xff] (%p36_p5)  ;;  %v255_v1 = vld [vmem:[%s1782_s18 + $0x8] sm:$0xff] (%p36_p5)  ;;  %v257_v2 = vld [vmem:[%s1782_s18 + $0x10] sm:$0xff] (%p36_p5) }
  0x17   : > { %254 = vst [vmem:[%s237_s19] sm:$0xff] (%p36_p5), %v253_v0  ;;  %256 = vst [vmem:[%s237_s19 + $0x8] sm:$0xff] (%p36_p5), %v255_v1  ;;  %v259_v3 = vld [vmem:[%s1782_s18 + $0x18] sm:$0xff] (%p36_p5)  ;;  %v261_v4 = vld [vmem:[%s1782_s18 + $0x40] sm:$0xff] (%p36_p5) }
  0x18   : > { %258 = vst [vmem:[%s237_s19 + $0x10] sm:$0xff] (%p36_p5), %v257_v2  ;;  %v263_v5 = vld [vmem:[%s1782_s18 + $0x48] sm:$0xff] (%p36_p5)  ;;  %260 = vst [vmem:[%s237_s19 + $0x18] sm:$0xff] (%p36_p5), %v259_v3  ;;  %v265_v6 = vld [vmem:[%s1782_s18 + $0x50] sm:$0xff] (%p36_p5) }
  0x19   : > { %262 = vst [vmem:[%s237_s19 + $0x20] sm:$0xff] (%p36_p5), %v261_v4  ;;  %264 = vst [vmem:[%s237_s19 + $0x28] sm:$0xff] (%p36_p5), %v263_v5  ;;  %v267_v7 = vld [vmem:[%s1782_s18 + $0x58] sm:$0xff] (%p36_p5)  ;;  %v269_v8 = vld [vmem:[%s1782_s18 + $0x80] sm:$0xff] (%p36_p5) }
  0x1a   : > { %266 = vst [vmem:[%s237_s19 + $0x30] sm:$0xff] %v265_v6  ;;  %268 = vst [vmem:[%s237_s19 + $0x38] sm:$0xff] %v267_v7  ;;  %v271_v9 = vld [vmem:[%s1782_s18 + $0x88] sm:$0xff]  ;;  %v273_v10 = vld [vmem:[%s1782_s18 + $0x90] sm:$0xff] }
  0x1b   : > { %270 = vst [vmem:[%s237_s19 + $0x40] sm:$0xff] %v269_v8  ;;  %v275_v11 = vld [vmem:[%s1782_s18 + $0x98] sm:$0xff]  ;;  %272 = vst [vmem:[%s237_s19 + $0x48] sm:$0xff] %v271_v9  ;;  %v277_v12 = vld [vmem:[%s1782_s18 + $0xc0] sm:$0xff] }
  0x1c   : > { %274 = vst [vmem:[%s237_s19 + $0x50] sm:$0xff] %v273_v10  ;;  %276 = vst [vmem:[%s237_s19 + $0x58] sm:$0xff] %v275_v11  ;;  %v279_v13 = vld [vmem:[%s1782_s18 + $0xc8] sm:$0xff]  ;;  %v281_v14 = vld [vmem:[%s1782_s18 + $0xd0] sm:$0xff] }
  0x1d   : > { %278 = vst [vmem:[%s237_s19 + $0x60] sm:$0xff] %v277_v12  ;;  %280 = vst [vmem:[%s237_s19 + $0x68] sm:$0xff] %v279_v13  ;;  %v283_v15 = vld [vmem:[%s1782_s18 + $0xd8] sm:$0xff] }
  0x1e   : > { %282 = vst [vmem:[%s237_s19 + $0x70] sm:$0xff] %v281_v14  ;;  %284 = vst [vmem:[%s237_s19 + $0x78] sm:$0xff] %v283_v15 }
  0x1f PF: > { %p1310_p10 = scmp.ge.s32.totalorder %s1680_s27, 1  ;;  %p289_p11 = scmp.lt.s32.totalorder %s1680_s27, 3 }
  0x21   : > { %p290_p12 = pnand %p1310_p10, %p289_p11 }
  0x22   : > { %s296_s20 = sand.u32 (!%p290_p12), 1, %s1672_s25   ;;  %v1682_v16 = vmov (!%p290_p12), 0.0   ;;  %v1683_v17 = vmov (!%p290_p12), 0   ;;  %v351_v18 = vld [vmem:[%s2063_s2] sm:$0xff] (!%p290_p12)  ;;  %v353_v19 = vld [vmem:[%s2063_s2 + $0x10] sm:$0xff] (!%p290_p12)  ;;  %v352_v23 = vld [vmem:[%s2063_s2 + $0x8] sm:$0xff] (!%p290_p12) }
  0x23   : > { %293 = sbr.rel (%p290_p12) target bundleno = 819 (0x333), region = 67  ;;  %s1805_s21 = sshll.u32 (!%p290_p12), %s296_s20, 7  ;;  %470 = vmatprep.mubr.f32.mxu0 (!%p290_p12), %v1682_v16  ;;  %571 = vmatprep.mubr.f32.mxu1 (!%p290_p12), %v1682_v16  ;;  %v354_v44 = vld [vmem:[%s2063_s2 + $0x18] sm:$0xff] (!%p290_p12)  ;;  %v355_v46 = vld [vmem:[%s2063_s2 + $0x20] sm:$0xff] (!%p290_p12)  ;;  %vm387_vm0 = vcmask (!%p290_p12), 261120   ;;  %v356_v48 = vld [vmem:[%s2063_s2 + $0x28] sm:$0xff] (!%p290_p12) }
  0x24   : > { %1472 = vset.pattern.permute.xlu0 (!%p290_p12), %v1683_v17  ;;  %1473 = vset.pattern.permute.xlu1 (!%p290_p12), %v1683_v17  ;;  %s298_s9 = scalar_lea.vmem (!%p290_p12), [#allocation2], %s1805_s21  ;;  %v345_v47 = vld [vmem:[%s2062_s1] sm:$0xff] (!%p290_p12)  ;;  %v346_v50 = vld [vmem:[%s2062_s1 + $0x8] sm:$0xff] (!%p290_p12)  ;;  %v642_v52 = vld [vmem:[%s2065_s4 + $0x10] sm:$0xff] (!%p290_p12)  ;;  %vm688_vm1 = vcmask (!%p290_p12), 392192   ;;  %vm999_vm2 = vcmask (!%p290_p12), 523264  }
  0x25   : > { %v330_v20 = vld [vmem:[%s298_s9 + $0x8] sm:$0xff] (!%p290_p12)  ;;  %v332_v22 = vld [vmem:[%s298_s9 + $0x18] sm:$0xff] (!%p290_p12)  ;;  %359 = vperm.xlu0 (!%p290_p12), %1472, %v351_v18   ;;  %369 = vperm.xlu1 (!%p290_p12), %1473, %v353_v19   ;;  %v329_v26 = vld [vmem:[%s298_s9] sm:$0xff] (!%p290_p12)  ;;  %s1989_s23 = scalar_lea.vmem (!%p290_p12), [#allocation3], %s1805_s21  ;;  %s1355_s21 = sshll.u32 (!%p290_p12), %s1303_s28, 9 }
  0x26   : > { %v334_v21 = vld [vmem:[%s298_s9 + $0x28] sm:$0xff] (!%p290_p12)  ;;  %v336_v25 = vld [vmem:[%s298_s9 + $0x38] sm:$0xff] (!%p290_p12)  ;;  %v333_v27 = vld [vmem:[%s298_s9 + $0x20] sm:$0xff] (!%p290_p12)  ;;  %s1236_s29 = sshll.u32 (!%p290_p12), %s1989_s23, 4  ;;  %s2009_s13 = scalar_lea.hbm (!%p290_p12), %s2068_s7, %s1355_s21  ;;  %s2012_s29 = int_to_ptr.vmem [resolvable:$true] %s1236_s29 }
  0x27   : > { %v1356_v24 = vpack.c.bf16 (!%p290_p12), %v334_v21, %v330_v20  ;;  %v1364_v28 = vpack.c.bf16 (!%p290_p12), %v336_v25, %v332_v22  ;;  %v1358_v29 = vpack.c.bf16 (!%p290_p12), %v333_v27, %v329_v26  ;;  %v331_v30 = vld [vmem:[%s298_s9 + $0x10] sm:$0xff] (!%p290_p12)  ;;  %v338_v32 = vld [vmem:[%s298_s9 + $0x48] sm:$0xff] (!%p290_p12)  ;;  %v340_v35 = vld [vmem:[%s298_s9 + $0x58] sm:$0xff] (!%p290_p12)  ;;  %s2019_s28 = scalar_lea.sflag (!%p290_p12), [#allocation4], %s296_s20  ;;  %s1618_s14 = scalar_lea.vmem (!%p290_p12), %s2012_s29, 2048 }
  0x28   : > { %v335_v31 = vld [vmem:[%s298_s9 + $0x30] sm:$0xff] (!%p290_p12)  ;;  %v342_v34 = vld [vmem:[%s298_s9 + $0x68] sm:$0xff] (!%p290_p12)  ;;  %v344_v36 = vld [vmem:[%s298_s9 + $0x78] sm:$0xff] (!%p290_p12)  ;;  %p1619_p13 = scmp.ne.s32.totalorder (!%p290_p12), %s2012_s29, %s1618_s14  ;;  %s1684_s15 = smov (!%p290_p12), [#allocation3]  }
  0x29   : > { %1357 = vmatprep.subr.bf16.mxu0 (!%p290_p12), %v1356_v24  ;;  %v1366_v33 = vpack.c.bf16 (!%p290_p12), %v335_v31, %v331_v30  ;;  %1365 = vmatprep.subr.bf16.mxu1 (!%p290_p12), %v1364_v28  ;;  %v1360_v37 = vpack.c.bf16 (!%p290_p12), %v342_v34, %v338_v32  ;;  %v1368_v38 = vpack.c.bf16 (!%p290_p12), %v344_v36, %v340_v35  ;;  %v337_v39 = vld [vmem:[%s298_s9 + $0x40] sm:$0xff] (!%p290_p12)  ;;  %v339_v41 = vld [vmem:[%s298_s9 + $0x50] sm:$0xff] (!%p290_p12)  ;;  %v641_v51 = vld [vmem:[%s2065_s4 + $0x8] sm:$0xff] (!%p290_p12)  ;;  %s1622_s16 = sshll.u32 (!%p290_p12), %s1684_s15, 4  ;;  %s1623_s16 = int_to_ptr.vmem [resolvable:$false] %s1622_s16 }
  0x2a   : > { %1359 = vmatpush1.bf16.msra.mxu0 %v1358_v29  ;;  %v341_v40 = vld [vmem:[%s298_s9 + $0x60] sm:$0xff]  ;;  %v343_v43 = vld [vmem:[%s298_s9 + $0x70] sm:$0xff]  ;;  %364 = vperm.xlu0 %1472, %v352_v23   ;;  %v643_v54 = vld [vmem:[%s2065_s4 + $0x18] sm:$0xff]  ;;  %p1620_p0 = pnand %p1619_p13, %p1766_p6  ;;  %s1624_s17 = scalar_lea.vmem %s1623_s16, 4096 }
  0x2b   : > { %1367 = vmatpush1.bf16.msra.mxu1 %v1366_v33  ;;  %v1362_v42 = vpack.c.bf16 %v341_v40, %v337_v39  ;;  %1361 = vmatprep.subr.bf16.mxu0 %v1360_v37  ;;  %v1370_v45 = vpack.c.bf16 %v343_v43, %v339_v41  ;;  %v640_v49 = vld [vmem:[%s2065_s4] sm:$0xff]  ;;  %v347_v53 = vld [vmem:[%s2062_s1 + $0x10] sm:$0xff]  ;;  %v348_v56 = vld [vmem:[%s2062_s1 + $0x18] sm:$0xff]  ;;  %p1625_p2 = scmp.lt.s32.totalorder %s2012_s29, %s1623_s16  ;;  %p1626_p3 = scmp.lt.s32.totalorder %s1624_s17, %s1618_s14 }
  0x2c   : > { %1369 = vmatprep.subr.bf16.mxu1 %v1368_v38  ;;  %374 = vperm.xlu1 %1473, %v354_v44   ;;  %v644_v55 = vld [vmem:[%s2065_s4 + $0x20] sm:$0xff]  ;;  %v645_v57 = vld [vmem:[%s2065_s4 + $0x28] sm:$0xff]  ;;  %v646_v58 = vld [vmem:[%s2065_s4 + $0x30] sm:$0xff]  ;;  %p1621_p1 = pneg %p1620_p0 }
  0x2d   : > { %v349_v59 = vld [vmem:[%s2062_s1 + $0x20] sm:$0xff]  ;;  %v647_v60 = vld [vmem:[%s2065_s4 + $0x38] sm:$0xff]  ;;  %v350_v62 = vld [vmem:[%s2062_s1 + $0x28] sm:$0xff]  ;;  %p1627_p4 = por %p1626_p3, %p1625_p2 }
  0x2e   : > { %1363 = vmatpush1.bf16.msra.mxu0 %v1362_v42  ;;  %379 = vperm.xlu0 %1472, %v355_v46   ;;  %v975_v61 = vld [vmem:[%s2067_s6] sm:$0xff]  ;;  %v976_v63 = vld [vmem:[%s2067_s6 + $0x8] sm:$0xff]  ;;  %v977_v0 = vld [vmem:[%s2067_s6 + $0x10] sm:$0xff] }
  0x2f   : > { %1371 = vmatpush1.bf16.msra.mxu1 %v1370_v45  ;;  %v978_v1 = vld [vmem:[%s2067_s6 + $0x18] sm:$0xff]  ;;  %p1628_p5 = pnand %p1627_p4, %p1621_p1 }
  0x30   : > { %384 = vperm.xlu1 %1473, %v356_v48  }
  0x31   : > { %1313 = vmatmul.mubr.msk.f32.vlgmr.msra.gmra.mrb[0].mxu0 %vm387_vm0, %v345_v47 }
  0x32   : > { %1319 = vmatmul.mubr.msk.f32.vlgmr.msra.gmra.mrb[0].mxu1 %vm387_vm0, %v345_v47  ;;  %476 = vmatprep.mubr.f32.mxu0 %v1682_v16 }
  0x33   : > { %577 = vmatprep.mubr.f32.mxu1 %v1682_v16  ;;  %650 = vperm.xlu0 %1472, %v640_v49  }
  0x34   : > { %655 = vperm.xlu1 %1473, %v641_v51  }
  0x35   : > { %1314 = vmatmul.mubr.msk.f32.gmra.mrb[2].mxu0 %vm387_vm0, %v346_v50 }
  0x36   : > { %1320 = vmatmul.mubr.msk.f32.gmra.mrb[2].mxu1 %vm387_vm0, %v346_v50  ;;  %482 = vmatprep.mubr.f32.mxu0 %v1682_v16 }
  0x37   : > { %583 = vmatprep.mubr.f32.mxu1 %v1682_v16  ;;  %660 = vperm.xlu0 %1472, %v642_v52  }
  0x38   : > { %665 = vperm.xlu1 %1473, %v643_v54  }
  0x39   : > { %1315 = vmatmul.mubr.msk.f32.gmra.mrb[4].mxu0 %vm387_vm0, %v347_v53 }
  0x3a   : > { %1321 = vmatmul.mubr.msk.f32.gmra.mrb[4].mxu1 %vm387_vm0, %v347_v53  ;;  %488 = vmatprep.mubr.f32.mxu0 %v1682_v16 }
  0x3b   : > { %589 = vmatprep.mubr.f32.mxu1 %v1682_v16  ;;  %670 = vperm.xlu0 %1472, %v644_v55  }
  0x3c   : > { %675 = vperm.xlu1 %1473, %v645_v57  }
  0x3d   : > { %1316 = vmatmul.mubr.msk.f32.gmra.mrb[6].mxu0 %vm387_vm0, %v348_v56 }
  0x3e   : > { %1322 = vmatmul.mubr.msk.f32.gmra.mrb[6].mxu1 %vm387_vm0, %v348_v56  ;;  %494 = vmatprep.mubr.f32.mxu0 %v1682_v16 }
  0x3f   : > { %595 = vmatprep.mubr.f32.mxu1 %v1682_v16  ;;  %680 = vperm.xlu0 %1472, %v646_v58  }
  0x40   : > { %685 = vperm.xlu1 %1473, %v647_v60  }
  0x41   : > { %1317 = vmatmul.mubr.msk.f32.gmra.mrb[8].mxu0 %vm387_vm0, %v349_v59 }
  0x42   : > { %1323 = vmatmul.mubr.msk.f32.gmra.mrb[8].mxu1 %vm387_vm0, %v349_v59  ;;  %500 = vmatprep.mubr.f32.mxu0 %v1682_v16 }
  0x43   : > { %601 = vmatprep.mubr.f32.mxu1 %v1682_v16  ;;  %981 = vperm.xlu0 %1472, %v975_v61  }
  0x44   : > { %986 = vperm.xlu1 %1473, %v976_v63  }
  0x45   : > { %1318 = vmatmul.mubr.msk.f32.gmra.mrb[10].mxu0 %vm387_vm0, %v350_v62 }
  0x46   : > { %1324 = vmatmul.mubr.msk.f32.gmra.mrb[10].mxu1 %vm387_vm0, %v350_v62  ;;  %777 = vmatprep.mubr.f32.mxu0 %v1682_v16 }
  0x47   : > { %991 = vperm.xlu0 %1472, %v977_v0   ;;  %890 = vmatprep.mubr.f32.mxu1 %v1682_v16 }
  0x48   : > { %996 = vperm.xlu1 %1473, %v978_v1  }
  0xa4   : > { %v360_v2 = vpop.permute.xlu0 %359  ;;  %v370_v17 = vpop.permute.xlu1 %369 }
  0xa9   : > { %v365_v11 = vpop.permute.xlu0 %364 }
  0xab   : > { %v375_v30 = vpop.permute.xlu1 %374 }
  0xad   : > { %v380_v43 = vpop.permute.xlu0 %379 }
  0xaf   : > { %v385_v58 = vpop.permute.xlu1 %384 }
 0x104   : > { %v472_v3 = vpop.f32.mrb[0].mxu0 }
 0x105   : > { %v473_v4 = vadd.f32 %v472_v3, %v360_v2  ;;  %v573_v5 = vpop.f32.mrb[0].mxu1  ;;  %v474_v6 = vpop.f32.mrb[1].mxu0 }
 0x106   : > { %v574_v7 = vadd.f32 %v573_v5, %v360_v2  ;;  %v475_v8 = vadd.f32 %v474_v6, %v360_v2  ;;  %v575_v9 = vpop.f32.mrb[1].mxu1 }
 0x107   : > { %1474 = vtanh.f32 %v473_v4  ;;  %v576_v10 = vadd.f32 %v575_v9, %v360_v2 }
 0x108   : > { %1476 = vtanh.f32 %v574_v7  ;;  %v478_v12 = vpop.f32.mrb[2].mxu0 }
 0x109   : > { %1478 = vtanh.f32 %v475_v8  ;;  %v479_v13 = vadd.f32 %v478_v12, %v365_v11  ;;  %v579_v14 = vpop.f32.mrb[2].mxu1  ;;  %v480_v15 = vpop.f32.mrb[3].mxu0 }
 0x10a   : > { %1480 = vtanh.f32 %v576_v10  ;;  %v580_v18 = vadd.f32 %v579_v14, %v365_v11  ;;  %v481_v19 = vadd.f32 %v480_v15, %v365_v11  ;;  %v581_v20 = vpop.f32.mrb[3].mxu1 }
 0x10b   : > { %1482 = vtanh.f32 %v479_v13  ;;  %v582_v21 = vadd.f32 %v581_v20, %v365_v11 }
 0x10c   : > { %1484 = vtanh.f32 %v580_v18  ;;  %v484_v22 = vpop.f32.mrb[4].mxu0 }
 0x10d   : > { %1486 = vtanh.f32 %v481_v19  ;;  %v485_v23 = vadd.f32 %v484_v22, %v370_v17  ;;  %v585_v24 = vpop.f32.mrb[4].mxu1  ;;  %v486_v25 = vpop.f32.mrb[5].mxu0 }
 0x10e   : > { %1488 = vtanh.f32 %v582_v21  ;;  %v586_v26 = vadd.f32 %v585_v24, %v370_v17  ;;  %v487_v27 = vadd.f32 %v486_v25, %v370_v17  ;;  %v587_v28 = vpop.f32.mrb[5].mxu1 }
 0x10f   : > { %1490 = vtanh.f32 %v485_v23  ;;  %v588_v29 = vadd.f32 %v587_v28, %v370_v17 }
 0x110   : > { %1492 = vtanh.f32 %v586_v26  ;;  %v490_v31 = vpop.f32.mrb[6].mxu0 }
 0x111   : > { %v1475_v32 = vpop.eup %1474  ;;  %1494 = vtanh.f32 %v487_v27  ;;  %v491_v33 = vadd.f32 %v490_v31, %v375_v30  ;;  %v591_v34 = vpop.f32.mrb[6].mxu1  ;;  %v633_v31 = vld [vmem:[%s2064_s3 + $0x8] sm:$0xff] }
 0x112   : > { %v492_v35 = vpop.f32.mrb[7].mxu0  ;;  %v1477_v36 = vpop.eup %1476  ;;  %1496 = vtanh.f32 %v588_v29  ;;  %v592_v37 = vadd.f32 %v591_v34, %v375_v30  ;;  %v636_v34 = vld [vmem:[%s2064_s3 + $0x20] sm:$0xff] }
 0x113   : > { %v493_v38 = vadd.f32 %v492_v35, %v375_v30  ;;  %v593_v39 = vpop.f32.mrb[7].mxu1  ;;  %v1479_v40 = vpop.eup %1478  ;;  %1498 = vtanh.f32 %v491_v33  ;;  %v635_v33 = vld [vmem:[%s2064_s3 + $0x18] sm:$0xff]  ;;  %v637_v35 = vld [vmem:[%s2064_s3 + $0x28] sm:$0xff] }
 0x114   : > { %v594_v41 = vadd.f32 %v593_v39, %v375_v30  ;;  %v1481_v42 = vpop.eup %1480  ;;  %1500 = vtanh.f32 %v592_v37  ;;  %v496_v44 = vpop.f32.mrb[8].mxu0  ;;  %v632_v30 = vld [vmem:[%s2064_s3] sm:$0xff]  ;;  %v639_v37 = vld [vmem:[%s2064_s3 + $0x38] sm:$0xff] }
 0x115   : > { %v1483_v45 = vpop.eup %1482  ;;  %1502 = vtanh.f32 %v493_v38  ;;  %v497_v46 = vadd.f32 %v496_v44, %v380_v43  ;;  %v597_v47 = vpop.f32.mrb[8].mxu1 }
 0x116   : > { %v498_v48 = vpop.f32.mrb[9].mxu0  ;;  %v1485_v49 = vpop.eup %1484  ;;  %1504 = vtanh.f32 %v594_v41  ;;  %v598_v50 = vadd.f32 %v597_v47, %v380_v43  ;;  %v1374_v53 = vpack.c.bf16 %v1483_v45, %v1475_v32  ;;  %v634_v32 = vld [vmem:[%s2064_s3 + $0x10] sm:$0xff] }
 0x117   : > { %v499_v51 = vadd.f32 %v498_v48, %v380_v43  ;;  %v599_v52 = vpop.f32.mrb[9].mxu1  ;;  %v1487_v54 = vpop.eup %1486  ;;  %1506 = vtanh.f32 %v497_v46  ;;  %v1386_v56 = vpack.c.bf16 %v1485_v49, %v1477_v36  ;;  %v638_v36 = vld [vmem:[%s2064_s3 + $0x30] sm:$0xff] }
 0x118   : > { %v600_v55 = vadd.f32 %v599_v52, %v380_v43  ;;  %v1489_v57 = vpop.eup %1488  ;;  %1508 = vtanh.f32 %v598_v50  ;;  %v502_v59 = vpop.f32.mrb[10].mxu0  ;;  %v1372_v60 = vpack.c.bf16 %v1487_v54, %v1479_v40 }
 0x119   : > { %v1491_v61 = vpop.eup %1490  ;;  %1510 = vtanh.f32 %v499_v51  ;;  %v503_v62 = vadd.f32 %v502_v59, %v385_v58  ;;  %v603_v63 = vpop.f32.mrb[10].mxu1  ;;  %v1384_v1 = vpack.c.bf16 %v1489_v57, %v1481_v42 }
 0x11a   : > { %v504_v0 = vpop.f32.mrb[11].mxu0  ;;  %v1493_v2 = vpop.eup %1492  ;;  %1512 = vtanh.f32 %v600_v55  ;;  %v604_v3 = vadd.f32 %v603_v63, %v385_v58  ;;  %1373 = vmatprep.subr.bf16.mxu0 %v1372_v60 }
 0x11b   : > { %v505_v4 = vadd.f32 %v504_v0, %v385_v58  ;;  %v605_v5 = vpop.f32.mrb[11].mxu1  ;;  %v1495_v6 = vpop.eup %1494  ;;  %1514 = vtanh.f32 %v503_v62  ;;  %1385 = vmatprep.subr.bf16.mxu1 %v1384_v1  ;;  %1375 = vmatpush1.bf16.msra.mxu0 %v1374_v53 }
 0x11c   : > { %v606_v7 = vadd.f32 %v605_v5, %v385_v58  ;;  %v1497_v8 = vpop.eup %1496  ;;  %1516 = vtanh.f32 %v604_v3  ;;  %1387 = vmatpush1.bf16.msra.mxu1 %v1386_v56  ;;  %v651_v38 = vpop.permute.xlu0 %650 }
 0x11d   : > { %v1499_v9 = vpop.eup %1498  ;;  %1518 = vtanh.f32 %v505_v4  ;;  %v656_v47 = vpop.permute.xlu1 %655 }
 0x11e   : > { %v1501_v10 = vpop.eup %1500  ;;  %1520 = vtanh.f32 %v606_v7  ;;  %v1378_v11 = vpack.c.bf16 %v1499_v9, %v1491_v61 }
 0x11f   : > { %v1503_v12 = vpop.eup %1502  ;;  %v1390_v13 = vpack.c.bf16 %v1501_v10, %v1493_v2 }
 0x120   : > { %v1505_v14 = vpop.eup %1504  ;;  %v1376_v15 = vpack.c.bf16 %v1503_v12, %v1495_v6  ;;  %v661_v56 = vpop.permute.xlu0 %660 }
 0x121   : > { %v1507_v17 = vpop.eup %1506  ;;  %v1388_v18 = vpack.c.bf16 %v1505_v14, %v1497_v8  ;;  %v666_v1 = vpop.permute.xlu1 %665 }
 0x122   : > { %v1509_v19 = vpop.eup %1508  ;;  %1377 = vmatprep.subr.bf16.mxu0 %v1376_v15 }
 0x123   : > { %v1511_v20 = vpop.eup %1510  ;;  %1389 = vmatprep.subr.bf16.mxu1 %v1388_v18  ;;  %1379 = vmatpush1.bf16.msra.mxu0 %v1378_v11 }
 0x124   : > { %v1513_v21 = vpop.eup %1512  ;;  %1391 = vmatpush1.bf16.msra.mxu1 %v1390_v13  ;;  %v671_v14 = vpop.permute.xlu0 %670 }
 0x125   : > { %v1515_v22 = vpop.eup %1514 }
 0x126   : > { %v1517_v23 = vpop.eup %1516  ;;  %v1382_v24 = vpack.c.bf16 %v1515_v22, %v1507_v17 }
 0x127   : > { %v1519_v25 = vpop.eup %1518  ;;  %v1394_v26 = vpack.c.bf16 %v1517_v23, %v1509_v19 }
 0x128   : > { %v1521_v27 = vpop.eup %1520  ;;  %v1380_v28 = vpack.c.bf16 %v1519_v25, %v1511_v20 }
 0x129   : > { %v1392_v29 = vpack.c.bf16 %v1521_v27, %v1513_v21 }
 0x12a   : > { %1381 = vmatprep.subr.bf16.mxu0 %v1380_v28 }
 0x12b   : > { %1393 = vmatprep.subr.bf16.mxu1 %v1392_v29  ;;  %1383 = vmatpush1.bf16.msra.mxu0 %v1382_v24 }
 0x12c   : > { %1395 = vmatpush1.bf16.msra.mxu1 %v1394_v26 }
 0x12e   : > { %1325 = vmatmul.mubr.msk.f32.vlgmr.msra.gmra.mrb[12].mxu0 %vm688_vm1, %v632_v30 }
 0x12f   : > { %1333 = vmatmul.mubr.msk.f32.vlgmr.msra.gmra.mrb[12].mxu1 %vm688_vm1, %v632_v30  ;;  %783 = vmatprep.mubr.f32.mxu0 %v1682_v16  ;;  %v676_v30 = vpop.permute.xlu1 %675 }
 0x130   : > { %896 = vmatprep.mubr.f32.mxu1 %v1682_v16 }
 0x132   : > { %1326 = vmatmul.mubr.msk.f32.gmra.mrb[14].mxu0 %vm688_vm1, %v633_v31 }
 0x133   : > { %1334 = vmatmul.mubr.msk.f32.gmra.mrb[14].mxu1 %vm688_vm1, %v633_v31  ;;  %789 = vmatprep.mubr.f32.mxu0 %v1682_v16 }
 0x134   : > { %902 = vmatprep.mubr.f32.mxu1 %v1682_v16 }
 0x136   : > { %1327 = vmatmul.mubr.msk.f32.gmra.mrb[16].mxu0 %vm688_vm1, %v634_v32 }
 0x137   : > { %1335 = vmatmul.mubr.msk.f32.gmra.mrb[16].mxu1 %vm688_vm1, %v634_v32  ;;  %795 = vmatprep.mubr.f32.mxu0 %v1682_v16 }
 0x138   : > { %908 = vmatprep.mubr.f32.mxu1 %v1682_v16 }
 0x13a   : > { %1328 = vmatmul.mubr.msk.f32.gmra.mrb[18].mxu0 %vm688_vm1, %v635_v33 }
 0x13b   : > { %1336 = vmatmul.mubr.msk.f32.gmra.mrb[18].mxu1 %vm688_vm1, %v635_v33  ;;  %801 = vmatprep.mubr.f32.mxu0 %v1682_v16 }
 0x13c   : > { %914 = vmatprep.mubr.f32.mxu1 %v1682_v16 }
 0x13e   : > { %1329 = vmatmul.mubr.msk.f32.gmra.mrb[20].mxu0 %vm688_vm1, %v636_v34 }
 0x13f   : > { %1337 = vmatmul.mubr.msk.f32.gmra.mrb[20].mxu1 %vm688_vm1, %v636_v34  ;;  %807 = vmatprep.mubr.f32.mxu0 %v1682_v16 }
 0x140   : > { %920 = vmatprep.mubr.f32.mxu1 %v1682_v16 }
 0x142   : > { %1330 = vmatmul.mubr.msk.f32.gmra.mrb[22].mxu0 %vm688_vm1, %v637_v35 }
 0x143   : > { %1338 = vmatmul.mubr.msk.f32.gmra.mrb[22].mxu1 %vm688_vm1, %v637_v35  ;;  %813 = vmatprep.mubr.f32.mxu0 %v1682_v16 }
 0x144   : > { %926 = vmatprep.mubr.f32.mxu1 %v1682_v16 }
 0x146   : > { %1331 = vmatmul.mubr.msk.f32.gmra.mrb[24].mxu0 %vm688_vm1, %v638_v36 }
 0x147   : > { %1339 = vmatmul.mubr.msk.f32.gmra.mrb[24].mxu1 %vm688_vm1, %v638_v36  ;;  %819 = vmatprep.mubr.f32.mxu0 %v1682_v16 }
 0x148   : > { %932 = vmatprep.mubr.f32.mxu1 %v1682_v16 }
 0x14a   : > { %1332 = vmatmul.mubr.msk.f32.gmra.mrb[26].mxu0 %vm688_vm1, %v639_v37 }
 0x14b   : > { %1340 = vmatmul.mubr.msk.f32.gmra.mrb[26].mxu1 %vm688_vm1, %v639_v37  ;;  %1076 = vmatprep.mubr.f32.mxu0 %v1682_v16 }
 0x14c   : > { %1165 = vmatprep.mubr.f32.mxu1 %v1682_v16 }
 0x201   : > { %v779_v39 = vpop.f32.mrb[12].mxu0 }
 0x202   : > { %v780_v40 = vadd.f32 %v779_v39, %v651_v38  ;;  %v892_v41 = vpop.f32.mrb[12].mxu1  ;;  %v781_v42 = vpop.f32.mrb[13].mxu0 }
 0x203   : > { %v893_v43 = vadd.f32 %v892_v41, %v651_v38  ;;  %v782_v44 = vadd.f32 %v781_v42, %v651_v38  ;;  %v894_v45 = vpop.f32.mrb[13].mxu1 }
 0x204   : > { %1522 = vtanh.f32 %v780_v40  ;;  %v895_v46 = vadd.f32 %v894_v45, %v651_v38  ;;  %v681_v45 = vpop.permute.xlu0 %680 }
 0x205   : > { %1524 = vtanh.f32 %v893_v43  ;;  %v785_v48 = vpop.f32.mrb[14].mxu0 }
 0x206   : > { %1526 = vtanh.f32 %v782_v44  ;;  %v786_v49 = vadd.f32 %v785_v48, %v656_v47  ;;  %v898_v50 = vpop.f32.mrb[14].mxu1  ;;  %v787_v51 = vpop.f32.mrb[15].mxu0 }
 0x207   : > { %1528 = vtanh.f32 %v895_v46  ;;  %v899_v52 = vadd.f32 %v898_v50, %v656_v47  ;;  %v788_v53 = vadd.f32 %v787_v51, %v656_v47  ;;  %v900_v54 = vpop.f32.mrb[15].mxu1 }
 0x208   : > { %1530 = vtanh.f32 %v786_v49  ;;  %v901_v55 = vadd.f32 %v900_v54, %v656_v47 }
 0x209   : > { %1532 = vtanh.f32 %v899_v52  ;;  %v791_v57 = vpop.f32.mrb[16].mxu0 }
 0x20a   : > { %1534 = vtanh.f32 %v788_v53  ;;  %v792_v58 = vadd.f32 %v791_v57, %v661_v56  ;;  %v904_v59 = vpop.f32.mrb[16].mxu1  ;;  %v793_v60 = vpop.f32.mrb[17].mxu0 }
 0x20b   : > { %1536 = vtanh.f32 %v901_v55  ;;  %v905_v61 = vadd.f32 %v904_v59, %v661_v56  ;;  %v794_v62 = vadd.f32 %v793_v60, %v661_v56  ;;  %v906_v63 = vpop.f32.mrb[17].mxu1  ;;  %v686_v60 = vpop.permute.xlu1 %685 }
 0x20c   : > { %1538 = vtanh.f32 %v792_v58  ;;  %v907_v0 = vadd.f32 %v906_v63, %v661_v56 }
 0x20d   : > { %1540 = vtanh.f32 %v905_v61  ;;  %v797_v2 = vpop.f32.mrb[18].mxu0 }
 0x20e   : > { %v1523_v3 = vpop.eup %1522  ;;  %1542 = vtanh.f32 %v794_v62  ;;  %v798_v4 = vadd.f32 %v797_v2, %v666_v1  ;;  %v910_v5 = vpop.f32.mrb[18].mxu1 }
 0x20f   : > { %v799_v6 = vpop.f32.mrb[19].mxu0  ;;  %v1525_v7 = vpop.eup %1524  ;;  %1544 = vtanh.f32 %v907_v0  ;;  %v911_v8 = vadd.f32 %v910_v5, %v666_v1 }
 0x210   : > { %v800_v9 = vadd.f32 %v799_v6, %v666_v1  ;;  %v912_v10 = vpop.f32.mrb[19].mxu1  ;;  %v1527_v11 = vpop.eup %1526  ;;  %1546 = vtanh.f32 %v798_v4 }
 0x211   : > { %v913_v12 = vadd.f32 %v912_v10, %v666_v1  ;;  %v1529_v13 = vpop.eup %1528  ;;  %1548 = vtanh.f32 %v911_v8  ;;  %v803_v15 = vpop.f32.mrb[20].mxu0 }
 0x212   : > { %v1531_v17 = vpop.eup %1530  ;;  %1550 = vtanh.f32 %v800_v9  ;;  %v804_v18 = vadd.f32 %v803_v15, %v671_v14  ;;  %v916_v19 = vpop.f32.mrb[20].mxu1 }
 0x213   : > { %v805_v20 = vpop.f32.mrb[21].mxu0  ;;  %v1533_v21 = vpop.eup %1532  ;;  %1552 = vtanh.f32 %v913_v12  ;;  %v917_v22 = vadd.f32 %v916_v19, %v671_v14  ;;  %v1398_v25 = vpack.c.bf16 %v1531_v17, %v1523_v3 }
 0x214   : > { %v806_v23 = vadd.f32 %v805_v20, %v671_v14  ;;  %v918_v24 = vpop.f32.mrb[21].mxu1  ;;  %v1535_v26 = vpop.eup %1534  ;;  %1554 = vtanh.f32 %v804_v18  ;;  %v1414_v28 = vpack.c.bf16 %v1533_v21, %v1525_v7 }
 0x215   : > { %v919_v27 = vadd.f32 %v918_v24, %v671_v14  ;;  %v1537_v29 = vpop.eup %1536  ;;  %1556 = vtanh.f32 %v917_v22  ;;  %v809_v31 = vpop.f32.mrb[22].mxu0  ;;  %v1396_v32 = vpack.c.bf16 %v1535_v26, %v1527_v11 }
 0x216   : > { %v1539_v33 = vpop.eup %1538  ;;  %1558 = vtanh.f32 %v806_v23  ;;  %v810_v34 = vadd.f32 %v809_v31, %v676_v30  ;;  %v922_v35 = vpop.f32.mrb[22].mxu1  ;;  %v1412_v37 = vpack.c.bf16 %v1537_v29, %v1529_v13 }
 0x217   : > { %v811_v36 = vpop.f32.mrb[23].mxu0  ;;  %v1541_v38 = vpop.eup %1540  ;;  %1560 = vtanh.f32 %v919_v27  ;;  %v923_v39 = vadd.f32 %v922_v35, %v676_v30  ;;  %1397 = vmatprep.subr.bf16.mxu0 %v1396_v32  ;;  %v971_v32 = vld [vmem:[%s2066_s5] sm:$0xff]  ;;  %v974_v35 = vld [vmem:[%s2066_s5 + $0x18] sm:$0xff] }
 0x218   : > { %v812_v40 = vadd.f32 %v811_v36, %v676_v30  ;;  %v924_v41 = vpop.f32.mrb[23].mxu1  ;;  %v1543_v42 = vpop.eup %1542  ;;  %1562 = vtanh.f32 %v810_v34  ;;  %1413 = vmatprep.subr.bf16.mxu1 %v1412_v37  ;;  %1399 = vmatpush1.bf16.msra.mxu0 %v1398_v25  ;;  %v973_v34 = vld [vmem:[%s2066_s5 + $0x10] sm:$0xff] }
 0x219   : > { %v925_v43 = vadd.f32 %v924_v41, %v676_v30  ;;  %v1545_v44 = vpop.eup %1544  ;;  %1564 = vtanh.f32 %v923_v39  ;;  %1415 = vmatpush1.bf16.msra.mxu1 %v1414_v28  ;;  %v815_v46 = vpop.f32.mrb[24].mxu0 }
 0x21a   : > { %v1547_v47 = vpop.eup %1546  ;;  %1566 = vtanh.f32 %v812_v40  ;;  %v816_v48 = vadd.f32 %v815_v46, %v681_v45  ;;  %v928_v49 = vpop.f32.mrb[24].mxu1 }
 0x21b   : > { %v817_v50 = vpop.f32.mrb[25].mxu0  ;;  %v1549_v51 = vpop.eup %1548  ;;  %1568 = vtanh.f32 %v925_v43  ;;  %v929_v52 = vadd.f32 %v928_v49, %v681_v45  ;;  %v1402_v55 = vpack.c.bf16 %v1547_v47, %v1539_v33  ;;  %v972_v33 = vld [vmem:[%s2066_s5 + $0x8] sm:$0xff] }
 0x21c   : > { %v818_v53 = vadd.f32 %v817_v50, %v681_v45  ;;  %v930_v54 = vpop.f32.mrb[25].mxu1  ;;  %v1551_v56 = vpop.eup %1550  ;;  %1570 = vtanh.f32 %v816_v48  ;;  %v1418_v58 = vpack.c.bf16 %v1549_v51, %v1541_v38 }
 0x21d   : > { %v931_v57 = vadd.f32 %v930_v54, %v681_v45  ;;  %v1553_v59 = vpop.eup %1552  ;;  %1572 = vtanh.f32 %v929_v52  ;;  %v821_v61 = vpop.f32.mrb[26].mxu0  ;;  %v1400_v62 = vpack.c.bf16 %v1551_v56, %v1543_v42 }
 0x21e   : > { %v1555_v63 = vpop.eup %1554  ;;  %1574 = vtanh.f32 %v818_v53  ;;  %v822_v0 = vadd.f32 %v821_v61, %v686_v60  ;;  %v934_v1 = vpop.f32.mrb[26].mxu1  ;;  %v1416_v3 = vpack.c.bf16 %v1553_v59, %v1545_v44 }
 0x21f   : > { %v823_v2 = vpop.f32.mrb[27].mxu0  ;;  %v1557_v4 = vpop.eup %1556  ;;  %1576 = vtanh.f32 %v931_v57  ;;  %v935_v5 = vadd.f32 %v934_v1, %v686_v60  ;;  %1401 = vmatprep.subr.bf16.mxu0 %v1400_v62 }
 0x220   : > { %v824_v6 = vadd.f32 %v823_v2, %v686_v60  ;;  %v936_v7 = vpop.f32.mrb[27].mxu1  ;;  %v1559_v8 = vpop.eup %1558  ;;  %1578 = vtanh.f32 %v822_v0  ;;  %1417 = vmatprep.subr.bf16.mxu1 %v1416_v3  ;;  %1403 = vmatpush1.bf16.msra.mxu0 %v1402_v55 }
 0x221   : > { %v937_v9 = vadd.f32 %v936_v7, %v686_v60  ;;  %v1561_v10 = vpop.eup %1560  ;;  %1580 = vtanh.f32 %v935_v5  ;;  %1419 = vmatpush1.bf16.msra.mxu1 %v1418_v58  ;;  %v982_v36 = vpop.permute.xlu0 %981 }
 0x222   : > { %v1563_v11 = vpop.eup %1562  ;;  %1582 = vtanh.f32 %v824_v6  ;;  %v987_v45 = vpop.permute.xlu1 %986 }
 0x223   : > { %v1565_v12 = vpop.eup %1564  ;;  %1584 = vtanh.f32 %v937_v9  ;;  %v1406_v13 = vpack.c.bf16 %v1563_v11, %v1555_v63 }
 0x224   : > { %v1567_v14 = vpop.eup %1566  ;;  %v1422_v15 = vpack.c.bf16 %v1565_v12, %v1557_v4 }
 0x225   : > { %v1569_v17 = vpop.eup %1568  ;;  %v1404_v18 = vpack.c.bf16 %v1567_v14, %v1559_v8  ;;  %v992_v53 = vpop.permute.xlu0 %991 }
 0x226   : > { %v1571_v19 = vpop.eup %1570  ;;  %v1420_v20 = vpack.c.bf16 %v1569_v17, %v1561_v10  ;;  %v997_v62 = vpop.permute.xlu1 %996 }
 0x227   : > { %v1573_v21 = vpop.eup %1572  ;;  %1405 = vmatprep.subr.bf16.mxu0 %v1404_v18 }
 0x228   : > { %v1575_v22 = vpop.eup %1574  ;;  %1421 = vmatprep.subr.bf16.mxu1 %v1420_v20  ;;  %1407 = vmatpush1.bf16.msra.mxu0 %v1406_v13 }
 0x229   : > { %v1577_v23 = vpop.eup %1576  ;;  %1423 = vmatpush1.bf16.msra.mxu1 %v1422_v15 }
 0x22a   : > { %v1579_v24 = vpop.eup %1578 }
 0x22b   : > { %v1581_v25 = vpop.eup %1580  ;;  %v1410_v26 = vpack.c.bf16 %v1579_v24, %v1571_v19 }
 0x22c   : > { %v1583_v27 = vpop.eup %1582  ;;  %v1426_v28 = vpack.c.bf16 %v1581_v25, %v1573_v21 }
 0x22d   : > { %v1585_v29 = vpop.eup %1584  ;;  %v1408_v30 = vpack.c.bf16 %v1583_v27, %v1575_v22 }
 0x22e   : > { %v1424_v31 = vpack.c.bf16 %v1585_v29, %v1577_v23 }
 0x22f   : > { %1409 = vmatprep.subr.bf16.mxu0 %v1408_v30 }
 0x230   : > { %1425 = vmatprep.subr.bf16.mxu1 %v1424_v31  ;;  %1411 = vmatpush1.bf16.msra.mxu0 %v1410_v26 }
 0x231   : > { %1427 = vmatpush1.bf16.msra.mxu1 %v1426_v28 }
 0x233   : > { %1341 = vmatmul.mubr.msk.f32.vlgmr.msra.gmra.mrb[28].mxu0 %vm999_vm2, %v971_v32 }
 0x234   : > { %1345 = vmatmul.mubr.msk.f32.vlgmr.msra.gmra.mrb[28].mxu1 %vm999_vm2, %v971_v32  ;;  %1082 = vmatprep.mubr.f32.mxu0 %v1682_v16 }
 0x235   : > { %1171 = vmatprep.mubr.f32.mxu1 %v1682_v16 }
 0x237   : > { %1342 = vmatmul.mubr.msk.f32.gmra.mrb[30].mxu0 %vm999_vm2, %v972_v33 }
 0x238   : > { %1346 = vmatmul.mubr.msk.f32.gmra.mrb[30].mxu1 %vm999_vm2, %v972_v33  ;;  %1088 = vmatprep.mubr.f32.mxu0 %v1682_v16 }
 0x239   : > { %1177 = vmatprep.mubr.f32.mxu1 %v1682_v16 }
 0x23b   : > { %1343 = vmatmul.mubr.msk.f32.gmra.mrb[32].mxu0 %vm999_vm2, %v973_v34 }
 0x23c   : > { %1347 = vmatmul.mubr.msk.f32.gmra.mrb[32].mxu1 %vm999_vm2, %v973_v34  ;;  %1094 = vmatprep.mubr.f32.mxu0 %v1682_v16 }
 0x23d   : > { %1183 = vmatprep.mubr.f32.mxu1 %v1682_v16 }
 0x23f   : > { %1344 = vmatmul.mubr.msk.f32.gmra.mrb[34].mxu0 %vm999_vm2, %v974_v35 }
 0x240   : > { %1348 = vmatmul.mubr.msk.f32.gmra.mrb[34].mxu1 %vm999_vm2, %v974_v35 }
 0x306   : > { %v1078_v37 = vpop.f32.mrb[28].mxu0 }
 0x307   : > { %v1079_v38 = vadd.f32 %v1078_v37, %v982_v36  ;;  %v1167_v39 = vpop.f32.mrb[28].mxu1  ;;  %v1080_v40 = vpop.f32.mrb[29].mxu0 }
 0x308   : > { %v1168_v41 = vadd.f32 %v1167_v39, %v982_v36  ;;  %v1081_v42 = vadd.f32 %v1080_v40, %v982_v36  ;;  %v1169_v43 = vpop.f32.mrb[29].mxu1 }
 0x309   : > { %1586 = vtanh.f32 %v1079_v38  ;;  %v1170_v44 = vadd.f32 %v1169_v43, %v982_v36 }
 0x30a   : > { %1588 = vtanh.f32 %v1168_v41  ;;  %v1084_v46 = vpop.f32.mrb[30].mxu0 }
 0x30b   : > { %1590 = vtanh.f32 %v1081_v42  ;;  %v1085_v47 = vadd.f32 %v1084_v46, %v987_v45  ;;  %v1173_v16 = vpop.f32.mrb[30].mxu1  ;;  %v1086_v48 = vpop.f32.mrb[31].mxu0 }
 0x30c   : > { %1592 = vtanh.f32 %v1170_v44  ;;  %v1174_v49 = vadd.f32 %v1173_v16, %v987_v45  ;;  %v1087_v50 = vadd.f32 %v1086_v48, %v987_v45  ;;  %v1175_v51 = vpop.f32.mrb[31].mxu1 }
 0x30d   : > { %1594 = vtanh.f32 %v1085_v47  ;;  %v1176_v52 = vadd.f32 %v1175_v51, %v987_v45 }
 0x30e   : > { %1596 = vtanh.f32 %v1174_v49  ;;  %v1090_v54 = vpop.f32.mrb[32].mxu0 }
 0x30f   : > { %1598 = vtanh.f32 %v1087_v50  ;;  %v1091_v55 = vadd.f32 %v1090_v54, %v992_v53  ;;  %v1179_v56 = vpop.f32.mrb[32].mxu1  ;;  %v1092_v57 = vpop.f32.mrb[33].mxu0 }
 0x310   : > { %1600 = vtanh.f32 %v1176_v52  ;;  %v1180_v58 = vadd.f32 %v1179_v56, %v992_v53  ;;  %v1093_v59 = vadd.f32 %v1092_v57, %v992_v53  ;;  %v1181_v60 = vpop.f32.mrb[33].mxu1 }
 0x311   : > { %1602 = vtanh.f32 %v1091_v55  ;;  %v1182_v61 = vadd.f32 %v1181_v60, %v992_v53 }
 0x312   : > { %1604 = vtanh.f32 %v1180_v58  ;;  %v1096_v63 = vpop.f32.mrb[34].mxu0 }
 0x313   : > { %v1587_v0 = vpop.eup %1586  ;;  %1606 = vtanh.f32 %v1093_v59  ;;  %v1097_v1 = vadd.f32 %v1096_v63, %v997_v62  ;;  %v1185_v2 = vpop.f32.mrb[34].mxu1 }
 0x314   : > { %v1098_v3 = vpop.f32.mrb[35].mxu0  ;;  %v1589_v4 = vpop.eup %1588  ;;  %1206 = vst [vmem:[%s1989_s23] sm:$0xff] %v1587_v0  ;;  %1608 = vtanh.f32 %v1182_v61  ;;  %v1186_v5 = vadd.f32 %v1185_v2, %v997_v62 }
 0x315   : > { %v1099_v6 = vadd.f32 %v1098_v3, %v997_v62  ;;  %v1187_v7 = vpop.f32.mrb[35].mxu1  ;;  %v1591_v8 = vpop.eup %1590  ;;  %1208 = vst [vmem:[%s1989_s23 + $0x10] sm:$0xff] %v1589_v4  ;;  %1610 = vtanh.f32 %v1097_v1 }
 0x316   : > { %v1188_v9 = vadd.f32 %v1187_v7, %v997_v62  ;;  %v1593_v10 = vpop.eup %1592  ;;  %1207 = vst [vmem:[%s1989_s23 + $0x8] sm:$0xff] %v1591_v8  ;;  %1612 = vtanh.f32 %v1186_v5 }
 0x317   : > { %v1595_v11 = vpop.eup %1594  ;;  %1209 = vst [vmem:[%s1989_s23 + $0x18] sm:$0xff] %v1593_v10  ;;  %1614 = vtanh.f32 %v1099_v6 }
 0x318   : > { %v1597_v12 = vpop.eup %1596  ;;  %1210 = vst [vmem:[%s1989_s23 + $0x20] sm:$0xff] %v1595_v11  ;;  %1616 = vtanh.f32 %v1188_v9 }
 0x319   : > { %v1599_v13 = vpop.eup %1598  ;;  %1212 = vst [vmem:[%s1989_s23 + $0x30] sm:$0xff] %v1597_v12 }
 0x31a   : > { %v1601_v14 = vpop.eup %1600  ;;  %1211 = vst [vmem:[%s1989_s23 + $0x28] sm:$0xff] %v1599_v13 }
 0x31b   : > { %v1603_v15 = vpop.eup %1602  ;;  %1213 = vst [vmem:[%s1989_s23 + $0x38] sm:$0xff] %v1601_v14 }
 0x31c   : > { %v1605_v17 = vpop.eup %1604  ;;  %1214 = vst [vmem:[%s1989_s23 + $0x40] sm:$0xff] %v1603_v15 }
 0x31d   : > { %v1607_v18 = vpop.eup %1606  ;;  %1216 = vst [vmem:[%s1989_s23 + $0x50] sm:$0xff] %v1605_v17 }
 0x31e   : > { %v1609_v19 = vpop.eup %1608  ;;  %1215 = vst [vmem:[%s1989_s23 + $0x48] sm:$0xff] %v1607_v18 }
 0x31f   : > { %v1611_v20 = vpop.eup %1610  ;;  %1217 = vst [vmem:[%s1989_s23 + $0x58] sm:$0xff] %v1609_v19 }
 0x320   : > { %v1613_v21 = vpop.eup %1612  ;;  %1218 = vst [vmem:[%s1989_s23 + $0x60] sm:$0xff] %v1611_v20 }
 0x321   : > { %v1615_v22 = vpop.eup %1614  ;;  %1220 = vst [vmem:[%s1989_s23 + $0x70] sm:$0xff] %v1613_v21 }
 0x322   : > { %v1617_v23 = vpop.eup %1616  ;;  %1219 = vst [vmem:[%s1989_s23 + $0x68] sm:$0xff] %v1615_v22 }
 0x323   : > { %1221 = vst [vmem:[%s1989_s23 + $0x78] sm:$0xff] %v1617_v23 }
 0x324   : > { %1631 = shalt.err (!%p1628_p5)
}
 0x325   : > { %s1632_s20 = scalar_lea.hbm %s2009_s13, 2048  ;;  %s1636_s22 = scalar_lea.hbm %s2068_s7, 4096 }
 0x326   : > { %p1633_p7 = scmp.ne.s32.totalorder %s2009_s13, %s1632_s20  ;;  %p1637_p12 = scmp.lt.u32.totalorder %s2009_s13, %s2068_s7 }
 0x327   : > { %p1638_p13 = scmp.lt.u32.totalorder %s1636_s22, %s1632_s20  ;;  %p1640_p1 = scmp.lt.u32.totalorder %s1632_s20, %s2009_s13 }
 0x328   : > { %p1634_p10 = pnand %p1633_p7, %p1766_p6 }
 0x329   : > { %p1639_p0 = por %p1638_p13, %p1637_p12 }
 0x32a   : > { %p1635_p11 = pneg %p1634_p10 }
 0x32b   : > { %p1641_p2 = por %p1640_p1, %p1639_p0 }
 0x32d   : > { %p1642_p3 = pnand %p1641_p2, %p1635_p11 }
 0x32f   : > { %1645 = shalt.err (!%p1642_p3)
}
 0x330   : > { %s1685_s8 = smov 512   ;;  %s1686_s9 = smov 1024  }
 0x331   : > { %s1687_s14 = smov 32  }
 0x332   : > { %1428 = dma.vmem_to_hbm [thread:$0]  (%p1766_p6), %s2012_s29, 2048, %s2009_s13, %s2019_s28, %s1685_s8, %s1686_s9, %s1687_s14  }
 0x333 PF: > { %s1251_s15 = sand.u32 1, %s1668_s24   ;;  %p1431_p4 = pnand %p1306_p9, %p1770_p8 }
 0x334   : > { %s1252_s16 = scalar_lea.sflag [#allocation4], %s1251_s15 }
 0x335   : > { %1663 = dma.done.wait (!%p1431_p4), %s1252_s16, 2048  }
 0x336   : > { %1665 = vsyncadd (!%p1431_p4), %s1252_s16, 4294965248  ;;  %p17_p5 = scmp.ge.s32.totalorder %s1751_s30, 4   ;;  %s2071_s24 = smov %s1672_s25 }
 0x337   : > { %s2072_s25 = smov %s1676_s26  ;;  %s2073_s26 = smov %s1764_s10 }
 0x338   : > { %s2074_s27 = smov %s1751_s30  ;;  %19 = sbr.rel (!%p17_p5) target bundleno = 3 (0x3), region = 111 }
 0x33f   :  { %1257 = vsyncpa [#allocation4], 1 }
 0x340   :  { %1259 = vsyncpa [#allocation4 + $0x1], 1 }

</bundles_post_ra>
